<compile_context>
chip_gen: v7x
topology: tpu7x:2x2x1
jax: 0.10.0
libtpu: 0.0.40
codegen_flags: <defaults>
</compile_context>

<pallas_src>
import jax
import jax.numpy as jnp
from jax import lax
from jax.experimental import pallas as pl
from jax.experimental.pallas import tpu as pltpu


# ----------------------------- parameter packing (wrapper-side) -----------------------------

def _pad_rows(a, multiple=8):
    pad = (-a.shape[0]) % multiple
    return jnp.pad(a, ((0, pad), (0, 0))) if pad else a


def pack_params(table, w_hh, fc_w, fc_b):
    """Pack all kernel parameters into one contiguous f32 buffer.

    Rows of each part are padded to a multiple of 8 so every static slice inside the kernel
    starts on a sublane boundary; columns are padded to a common width (<=128 lanes here).
    Returns (packed_buffer, row_offsets).
    """
    cols = max(table.shape[1], w_hh.shape[1], fc_w.shape[1], fc_b.shape[1])

    def prep(a):
        a = jnp.pad(a, ((0, 0), (0, cols - a.shape[1])))
        return _pad_rows(a)

    parts = [prep(table), prep(w_hh), prep(fc_w), prep(fc_b)]
    offsets, off = [], 0
    for p in parts:
        offsets.append(off)
        off += p.shape[0]
    return jnp.concatenate(parts, axis=0), tuple(offsets)


# ------------------------------------- Pallas kernel ---------------------------------------

def _make_kernel(S, vocab, hs, vs, offs):
    t_off, whh_off, fcw_off, fcb_off = offs

    def kernel(ids_ref, params_ref, out_ref):
        # Static slices of the single packed parameter buffer (all offsets sublane-aligned).
        table = params_ref[t_off:t_off + vocab, 0:hs]      # (vocab, hs)  = emb @ W_ih + bias
        whh   = params_ref[whh_off:whh_off + hs, 0:hs]     # (hs, hs)
        fcw   = params_ref[fcw_off:fcw_off + hs, 0:vs]     # (hs, vs)
        fcb   = params_ref[fcb_off:fcb_off + 1, 0:vs]      # (1, vs)

        # --- fused embedding + input projection: pre = onehot(ids) @ T -> (S, hs) ----------
        ids = ids_ref[...]                                                   # (S, 1) int32
        onehot = (ids == lax.broadcasted_iota(jnp.int32, (S, vocab), 1)).astype(jnp.float32)
        pre = jnp.dot(onehot, table, preferred_element_type=jnp.float32)     # (S, hs)

        # --- serial tanh recurrence; h kept in registers, statically unrolled --------------
        h = jnp.zeros((1, hs), jnp.float32)                                  # h_0 = 0
        h_rows = []
        for t in range(S):                                                   # S is static
            h = jnp.tanh(pre[t:t + 1, :]
                         + jnp.dot(h, whh, preferred_element_type=jnp.float32))
            h_rows.append(h)
        hseq = jnp.concatenate(h_rows, axis=0)                               # (S, hs)

        # --- batched FC + log-softmax epilogue, single full-block store ---------------------
        logits = jnp.dot(hseq, fcw, preferred_element_type=jnp.float32) + fcb
        m = jnp.max(logits, axis=-1, keepdims=True)
        lse = m + jnp.log(jnp.sum(jnp.exp(logits - m), axis=-1, keepdims=True))
        out_ref[...] = logits - lse

    return kernel


# ---------------------------------------- wrapper ------------------------------------------

def rnn_lm_forward(ids, emb, w_ih, w_hh, bias, fc_w, fc_b):
    S = ids.shape[0]
    vocab = emb.shape[0]
    hs = w_hh.shape[0]
    vs = fc_w.shape[1]

    # Weight-prep fusion (done once, outside the kernel):
    #   pre_t = emb[id_t] @ W_ih + (b_ih + b_hh)  ==  onehot(id_t) @ T
    table = emb @ w_ih + bias                                          # (vocab, hs)
    packed, offs = pack_params(table, w_hh, fc_w, fc_b)

    kernel = _make_kernel(S, vocab, hs, vs, offs)
    vmem = pl.BlockSpec(memory_space=pltpu.MemorySpace.VMEM)

    out = pl.pallas_call(
        kernel,
        out_shape=jax.ShapeDtypeStruct((S, vs), jnp.float32),
        in_specs=[vmem, vmem],          # 2 DMAs total: token ids + packed params (~15 KiB)
        out_specs=vmem,
    )(ids.reshape(S, 1).astype(jnp.int32), packed)

    # PyTorch module returns shape (seq_len, 1, vocab_size)
    return out.reshape(S, 1, vs)


# ------------------------------------ pure-JAX reference -----------------------------------

def reference_forward(ids, emb, w_ih, w_hh, bias, fc_w, fc_b):
    x = emb[ids]                                                      # (S, ed)

    def scan_step(h, x_t):
        h_new = jnp.tanh(x_t[None, :] @ w_ih + h @ w_hh + bias)      # (1, hs)
        return h_new, h_new[0]

    h0 = jnp.zeros((1, w_hh.shape[0]), jnp.float32)
    _, hs_seq = lax.scan(scan_step, h0, x)                           # (S, hs)
    logits = hs_seq @ fc_w + fc_b                                    # (S, vs)
    logp = jax.nn.log_softmax(logits, axis=-1)
    return logp.reshape(ids.shape[0], 1, -1)


# ------------------------------------------ main -------------------------------------------

if __name__ == "__main__":
    # Small shapes implied by the module: vocab=32, emb_dim=16, hidden=32, seq=8
    VS, ED, HS, SEQ = 32, 16, 32, 8

    key = jax.random.PRNGKey(0)
    k_emb, k_wih, k_whh, k_bih, k_bhh, k_fcw, k_fcb, k_ids = jax.random.split(key, 8)

    # Deterministic parameter init (mimicking PyTorch init scales)
    emb = jax.random.normal(k_emb, (VS, ED), jnp.float32)            # nn.Embedding ~ N(0,1)
    bound = 1.0 / jnp.sqrt(HS)
    w_ih = jax.random.uniform(k_wih, (ED, HS), jnp.float32, -bound, bound)  # torch W_ih^T
    w_hh = jax.random.uniform(k_whh, (HS, HS), jnp.float32, -bound, bound)  # torch W_hh^T
    b_ih = jax.random.uniform(k_bih, (1, HS), jnp.float32, -bound, bound)
    b_hh = jax.random.uniform(k_bhh, (1, HS), jnp.float32, -bound, bound)
    bias = b_ih + b_hh
    fc_w = jax.random.uniform(k_fcw, (HS, VS), jnp.float32, -bound, bound)  # torch Linear W^T
    fc_b = jax.random.uniform(k_fcb, (1, VS), jnp.float32, -bound, bound)

    ids = jax.random.randint(k_ids, (SEQ,), 0, VS, dtype=jnp.int32)

    y = rnn_lm_forward(ids, emb, w_ih, w_hh, bias, fc_w, fc_b)
    y = jax.block_until_ready(y)

    y_ref = reference_forward(ids, emb, w_ih, w_hh, bias, fc_w, fc_b)
    assert y.shape == (SEQ, 1, VS), y.shape
    assert jnp.allclose(y, y_ref, atol=1e-5, rtol=1e-5), "mismatch vs JAX reference"

    print("KERNEL_OK")
</pallas_src>

<mosaic_0001>
module attributes {stable_mosaic.version = 11 : i64} {
  func.func @kernel(%arg0: memref<8x1xi32, #tpu.memory_space<vmem>>, %arg1: memref<104x32xf32, #tpu.memory_space<vmem>>, %arg2: memref<8x32xf32, #tpu.memory_space<vmem>>) attributes {dimension_semantics = [], scalar_prefetch = 0 : i64, scratch_operands = 0 : i64, tpu.core_type = #tpu.core_type<tc>} {
    %c0 = arith.constant 0 : index
    %c0_0 = arith.constant 0 : index
    %0 = vector.load %arg1[%c0, %c0_0] : memref<104x32xf32, #tpu.memory_space<vmem>>, vector<32x32xf32>
    %c32 = arith.constant 32 : index
    %c0_1 = arith.constant 0 : index
    %1 = vector.load %arg1[%c32, %c0_1] : memref<104x32xf32, #tpu.memory_space<vmem>>, vector<32x32xf32>
    %c64 = arith.constant 64 : index
    %c0_2 = arith.constant 0 : index
    %2 = vector.load %arg1[%c64, %c0_2] : memref<104x32xf32, #tpu.memory_space<vmem>>, vector<32x32xf32>
    %c96 = arith.constant 96 : index
    %c0_3 = arith.constant 0 : index
    %3 = vector.load %arg1[%c96, %c0_3] : memref<104x32xf32, #tpu.memory_space<vmem>>, vector<1x32xf32>
    %c0_4 = arith.constant 0 : index
    %c0_5 = arith.constant 0 : index
    %4 = vector.load %arg0[%c0_4, %c0_5] : memref<8x1xi32, #tpu.memory_space<vmem>>, vector<8x1xi32>
    %5 = tpu.iota {dimensions = array<i32: 1>} : vector<8x32xi32>
    %6 = vector.broadcast %4 : vector<8x1xi32> to vector<8x32xi32>
    %7 = arith.cmpi eq, %6, %5 : vector<8x32xi32>
    %8 = arith.extui %7 : vector<8x32xi1> to vector<8x32xi32>
    %9 = arith.sitofp %8 : vector<8x32xi32> to vector<8x32xf32>
    %cst = arith.constant dense<0.000000e+00> : vector<8x32xf32>
    %10 = tpu.matmul %9, %0, %cst {dimension_numbers = #tpu.dot_dimension_numbers<[1], [0], [0], [1], [0, 0, 1, 1], [], []>} : vector<8x32xf32>, vector<32x32xf32>, vector<8x32xf32> -> vector<8x32xf32>
    %cst_6 = arith.constant 0.000000e+00 : f32
    %11 = vector.broadcast %cst_6 : f32 to vector<1x32xf32>
    %12 = vector.extract_strided_slice %10 {offsets = [0, 0], sizes = [1, 32], strides = [1, 1]} : vector<8x32xf32> to vector<1x32xf32>
    %cst_7 = arith.constant dense<0.000000e+00> : vector<1x32xf32>
    %13 = tpu.matmul %11, %1, %cst_7 {dimension_numbers = #tpu.dot_dimension_numbers<[1], [0], [0], [1], [0, 0, 1, 1], [], []>} : vector<1x32xf32>, vector<32x32xf32>, vector<1x32xf32> -> vector<1x32xf32>
    %14 = arith.addf %12, %13 : vector<1x32xf32>
    %15 = math.tanh %14 : vector<1x32xf32>
    %16 = vector.extract_strided_slice %10 {offsets = [1, 0], sizes = [1, 32], strides = [1, 1]} : vector<8x32xf32> to vector<1x32xf32>
    %cst_8 = arith.constant dense<0.000000e+00> : vector<1x32xf32>
    %17 = tpu.matmul %15, %1, %cst_8 {dimension_numbers = #tpu.dot_dimension_numbers<[1], [0], [0], [1], [0, 0, 1, 1], [], []>} : vector<1x32xf32>, vector<32x32xf32>, vector<1x32xf32> -> vector<1x32xf32>
    %18 = arith.addf %16, %17 : vector<1x32xf32>
    %19 = math.tanh %18 : vector<1x32xf32>
    %20 = vector.extract_strided_slice %10 {offsets = [2, 0], sizes = [1, 32], strides = [1, 1]} : vector<8x32xf32> to vector<1x32xf32>
    %cst_9 = arith.constant dense<0.000000e+00> : vector<1x32xf32>
    %21 = tpu.matmul %19, %1, %cst_9 {dimension_numbers = #tpu.dot_dimension_numbers<[1], [0], [0], [1], [0, 0, 1, 1], [], []>} : vector<1x32xf32>, vector<32x32xf32>, vector<1x32xf32> -> vector<1x32xf32>
    %22 = arith.addf %20, %21 : vector<1x32xf32>
    %23 = math.tanh %22 : vector<1x32xf32>
    %24 = vector.extract_strided_slice %10 {offsets = [3, 0], sizes = [1, 32], strides = [1, 1]} : vector<8x32xf32> to vector<1x32xf32>
    %cst_10 = arith.constant dense<0.000000e+00> : vector<1x32xf32>
    %25 = tpu.matmul %23, %1, %cst_10 {dimension_numbers = #tpu.dot_dimension_numbers<[1], [0], [0], [1], [0, 0, 1, 1], [], []>} : vector<1x32xf32>, vector<32x32xf32>, vector<1x32xf32> -> vector<1x32xf32>
    %26 = arith.addf %24, %25 : vector<1x32xf32>
    %27 = math.tanh %26 : vector<1x32xf32>
    %28 = vector.extract_strided_slice %10 {offsets = [4, 0], sizes = [1, 32], strides = [1, 1]} : vector<8x32xf32> to vector<1x32xf32>
    %cst_11 = arith.constant dense<0.000000e+00> : vector<1x32xf32>
    %29 = tpu.matmul %27, %1, %cst_11 {dimension_numbers = #tpu.dot_dimension_numbers<[1], [0], [0], [1], [0, 0, 1, 1], [], []>} : vector<1x32xf32>, vector<32x32xf32>, vector<1x32xf32> -> vector<1x32xf32>
    %30 = arith.addf %28, %29 : vector<1x32xf32>
    %31 = math.tanh %30 : vector<1x32xf32>
    %32 = vector.extract_strided_slice %10 {offsets = [5, 0], sizes = [1, 32], strides = [1, 1]} : vector<8x32xf32> to vector<1x32xf32>
    %cst_12 = arith.constant dense<0.000000e+00> : vector<1x32xf32>
    %33 = tpu.matmul %31, %1, %cst_12 {dimension_numbers = #tpu.dot_dimension_numbers<[1], [0], [0], [1], [0, 0, 1, 1], [], []>} : vector<1x32xf32>, vector<32x32xf32>, vector<1x32xf32> -> vector<1x32xf32>
    %34 = arith.addf %32, %33 : vector<1x32xf32>
    %35 = math.tanh %34 : vector<1x32xf32>
    %36 = vector.extract_strided_slice %10 {offsets = [6, 0], sizes = [1, 32], strides = [1, 1]} : vector<8x32xf32> to vector<1x32xf32>
    %cst_13 = arith.constant dense<0.000000e+00> : vector<1x32xf32>
    %37 = tpu.matmul %35, %1, %cst_13 {dimension_numbers = #tpu.dot_dimension_numbers<[1], [0], [0], [1], [0, 0, 1, 1], [], []>} : vector<1x32xf32>, vector<32x32xf32>, vector<1x32xf32> -> vector<1x32xf32>
    %38 = arith.addf %36, %37 : vector<1x32xf32>
    %39 = math.tanh %38 : vector<1x32xf32>
    %40 = vector.extract_strided_slice %10 {offsets = [7, 0], sizes = [1, 32], strides = [1, 1]} : vector<8x32xf32> to vector<1x32xf32>
    %cst_14 = arith.constant dense<0.000000e+00> : vector<1x32xf32>
    %41 = tpu.matmul %39, %1, %cst_14 {dimension_numbers = #tpu.dot_dimension_numbers<[1], [0], [0], [1], [0, 0, 1, 1], [], []>} : vector<1x32xf32>, vector<32x32xf32>, vector<1x32xf32> -> vector<1x32xf32>
    %42 = arith.addf %40, %41 : vector<1x32xf32>
    %43 = math.tanh %42 : vector<1x32xf32>
    %44 = tpu.concatenate %15, %19, %23, %27, %31, %35, %39, %43 in 0 : vector<1x32xf32>, vector<1x32xf32>, vector<1x32xf32>, vector<1x32xf32>, vector<1x32xf32>, vector<1x32xf32>, vector<1x32xf32>, vector<1x32xf32> -> vector<8x32xf32>
    %cst_15 = arith.constant dense<0.000000e+00> : vector<8x32xf32>
    %45 = tpu.matmul %44, %2, %cst_15 {dimension_numbers = #tpu.dot_dimension_numbers<[1], [0], [0], [1], [0, 0, 1, 1], [], []>} : vector<8x32xf32>, vector<32x32xf32>, vector<8x32xf32> -> vector<8x32xf32>
    %46 = vector.broadcast %3 : vector<1x32xf32> to vector<8x32xf32>
    %47 = arith.addf %45, %46 : vector<8x32xf32>
    %cst_16 = arith.constant dense<0xFF800000> : vector<8xf32>
    %48 = vector.multi_reduction <maximumf>, %47, %cst_16 [1] : vector<8x32xf32> to vector<8xf32>
    %49 = vector.shape_cast %48 : vector<8xf32> to vector<8x1xf32>
    %50 = vector.broadcast %49 : vector<8x1xf32> to vector<8x32xf32>
    %51 = arith.subf %47, %50 : vector<8x32xf32>
    %52 = math.exp %51 : vector<8x32xf32>
    %cst_17 = arith.constant dense<0.000000e+00> : vector<8xf32>
    %53 = vector.multi_reduction <add>, %52, %cst_17 [1] : vector<8x32xf32> to vector<8xf32>
    %54 = vector.shape_cast %53 : vector<8xf32> to vector<8x1xf32>
    %55 = math.log %54 : vector<8x1xf32>
    %56 = arith.addf %49, %55 : vector<8x1xf32>
    %57 = vector.broadcast %56 : vector<8x1xf32> to vector<8x32xf32>
    %58 = arith.subf %47, %57 : vector<8x32xf32>
    %c0_18 = arith.constant 0 : index
    %c0_19 = arith.constant 0 : index
    %59 = vector.load %arg2[%c0_18, %c0_19] : memref<8x32xf32, #tpu.memory_space<vmem>>, vector<8x32xf32>
    tpu.vector_store %arg2[%c0_18, %c0_19], %58 {strides = array<i32>} : memref<8x32xf32, #tpu.memory_space<vmem>>, vector<8x32xf32>,
    return
  }
}

</mosaic_0001>

<bundles_post_ra>
// kernel: tpu_custom_call.1
= control target key start
LH: loop header
LB: loop body
LE: loop exit
PB: predicated region body
PF: predicated region fallthrough
CT: control target
= control target key end

     0   :  { %v1135_v3 = vmov 0   ;;  %v1136_v4 = vmov 0.0|0.0   ;;  %vm1137_vm0 = vmmov 0   ;;  %v1138_v14 = vmov 0.0   ;;  %s1293_s0 = inlined_call_operand.vmem [shape: s32[8,1], index: 0, kind: input, shape index: {}]   ;;  %s1294_s1 = inlined_call_operand.vmem [shape: f32[104,32], index: 1, kind: input, shape index: {}]   ;;  %s1295_s2 = inlined_call_operand.hbm [shape: f32[8,32], index: 2, kind: output, shape index: {}]  }
   0x1   :  { %v25_v0 = vld [vmem:[%s1293_s0] sm:$0xff]  ;;  %v17_v2 = vld [vmem:[%s1294_s1 + $0x28] sm:$0xff]  ;;  %1090 = vset.pattern.permute.xlu0 %v1135_v3  ;;  %1031 = vmatprep.subr.bf16.mxu1 %v1136_v4  ;;  %v18_v8 = vld [vmem:[%s1294_s1 + $0x30] sm:$0xff] }
   0x2   :  { %v16_v1 = vld [vmem:[%s1294_s1 + $0x20] sm:$0xff]  ;;  %v13_v7 = vld [vmem:[%s1294_s1 + $0x8] sm:$0xff]  ;;  %29 = vperm.xlu0 %1090, %v25_v0   ;;  %1025 = vmatprep.subr.bf16.mxu0 %v1136_v4  ;;  %v19_v10 = vld [vmem:[%s1294_s1 + $0x38] sm:$0xff] }
   0x3   :  { %v1165_v5 = vpack.c.bf16 %v17_v2, %v16_v1  ;;  %v12_v6 = vld [vmem:[%s1294_s1] sm:$0xff]  ;;  %v14_v11 = vld [vmem:[%s1294_s1 + $0x10] sm:$0xff]  ;;  %v15_v12 = vld [vmem:[%s1294_s1 + $0x18] sm:$0xff]  ;;  %v1187_v13 = vpack.c.bf16 %v19_v10, %v18_v8  ;;  %934 = vmatprep.mubr.msk.f32.mxu1 %vm1137_vm0, %v1138_v14 }
   0x4   :  { %v1026_v9 = vpack.c.bf16 %v13_v7, %v12_v6 }
   0x5   :  { %1033 = vmatpush3.bf16.msra.mxu1 %v1165_v5 }
   0x6   :  { %7 = vsyncpa [#allocation3], 0  ;;  %1027 = vmatpush3.bf16.msra.mxu0 %v1026_v9  ;;  %1034 = vmatprep.subr.bf16.mxu1 %v1136_v4  ;;  %v1029_v15 = vpack.c.bf16 %v15_v12, %v14_v11  ;;  %v26_v16 = vlaneseq  ;;  %vm34_vm1 = vcmask 261120   ;;  %vm735_vm3 = vcmask 1040384   ;;  %v21_v6 = vld [vmem:[%s1294_s1 + $0x48] sm:$0xff]  ;;  %v22_v7 = vld [vmem:[%s1294_s1 + $0x50] sm:$0xff] }
   0x7   :  { %1028 = vmatprep.subr.bf16.mxu0 %v1136_v4  ;;  %923 = vmatprep.mubr.msk.f32.mxu0 %vm1137_vm0, %v1138_v14  ;;  %vm737_vm4 = vcmask 1041408   ;;  %vm739_vm5 = vcmask 1042432   ;;  %vm741_vm6 = vcmask 1043456   ;;  %vm743_vm7 = vcmask 1044480   ;;  %v23_v9 = vld [vmem:[%s1294_s1 + $0x58] sm:$0xff]  ;;  %s1139_s8 = smov [#allocation2]  }
   0x8   :  { %v27_v17 = vand.u32 127, %v26_v16  ;;  %vm745_vm8 = vcmask 1045504   ;;  %v1083_v10 = vpack.c.bf16 %v23_v9, %v22_v7  ;;  %vm747_vm9 = vcmask 1046528  }
   0x9   :  { %1036 = vmatpush3.bf16.msra.mxu1 %v1187_v13 }
   0xa   :  { %1030 = vmatpush3.bf16.msra.mxu0 %v1029_v15  ;;  %1043 = vmatprep.subr.bf16.mxu1 %v1136_v4 }
   0xb   :  { %1037 = vmatprep.subr.bf16.mxu0 %v1136_v4 }
   0xc   :  { %935 = vmatmul.mubr.f32.vlgmr.msra.gmra.mrb[0].mxu1 %v1138_v14 }
   0xd   :  { %1045 = vmatpush3.bf16.msra.mxu1 %v1165_v5  ;;  %956 = vmatprep.mubr.msk.f32.mxu1 %vm1137_vm0, %v1138_v14 }
   0xe   :  { %1046 = vmatprep.subr.bf16.mxu1 %v1136_v4 }
  0x11   :  { %1048 = vmatpush3.bf16.msra.mxu1 %v1187_v13 }
  0x12   :  { %1055 = vmatprep.subr.bf16.mxu1 %v1136_v4 }
  0x81   :  { %v30_v18 = vpop.permute.xlu0 %29 }
  0x82   :  { %vm31_vm2 = vcmp.eq.s32.totalorder %v30_v18, %v27_v17  ;;  %v863_v17 = vld [vmem:[%s1294_s1 + $0x60] ss:$0 sm:$0xff] }
  0x83   :  { %v854_v19 = vsel %vm31_vm2, 1.0, %v1138_v14 }
  0x84   :  { %924 = vmatmul.mubr.msk.f32.vlgmr.msra.gmra.mrb[0].mxu0 %vm34_vm1, %v854_v19 }
  0x85   :  { %1039 = vmatpush3.bf16.msra.mxu0 %v1165_v5  ;;  %945 = vmatprep.mubr.msk.f32.mxu0 %vm1137_vm0, %v1138_v14 }
  0x86   :  { %1040 = vmatprep.subr.bf16.mxu0 %v1136_v4 }
  0x89   :  { %1042 = vmatpush3.bf16.msra.mxu0 %v1187_v13 }
  0x8a   :  { %1049 = vmatprep.subr.bf16.mxu0 %v1136_v4 }
  0xdf   :  { %v177_v20 = vpop.f32.mrb[0].mxu1 }
  0xe0   :  { %v936_v21 = vpop.f32.mrb[1].mxu1 }
 0x157   :  { %v1213_v22 = vpop.f32.mrb[0].mxu0 }
 0x158   :  { %v181_v23 = vadd.f32 %v177_v20, %v1213_v22  ;;  %v925_v24 = vpop.f32.mrb[1].mxu0 }
 0x15a   :  { %1091 = vtanh.f32 %v181_v23 }
 0x164   :  { %v1092_v25 = vpop.eup %1091 }
 0x165   :  { %946 = vmatmul.mubr.msk.f32.vlgmr.msra.gmra.mrb[2].mxu0 %vm34_vm1, %v1092_v25 }
 0x166   :  { %1051 = vmatpush3.bf16.msra.mxu0 %v1165_v5  ;;  %967 = vmatprep.mubr.msk.f32.mxu0 %vm1137_vm0, %v1138_v14 }
 0x167   :  { %1052 = vmatprep.subr.bf16.mxu0 %v1136_v4 }
 0x16a   :  { %1054 = vmatpush3.bf16.msra.mxu0 %v1187_v13 }
 0x16b   :  { %1061 = vmatprep.subr.bf16.mxu0 %v1136_v4 }
 0x238   :  { %v252_v26 = vpop.f32.mrb[2].mxu0 }
 0x239   :  { %v257_v27 = vrot.slane %v252_v26, 7  ;;  %v947_v28 = vpop.f32.mrb[3].mxu0 }
 0x23b   :  { %v259_v29 = vadd.f32 %v257_v27, %v1213_v22 }
 0x23d   :  { %1093 = vtanh.f32 %v259_v29 }
 0x247   :  { %v1094_v30 = vpop.eup %1093 }
 0x248   :  { %v262_v31 = vrot.slane %v1094_v30, 1  ;;  %v736_v37 = vsel %vm735_vm3, %v1092_v25, %v1094_v30 }
 0x24a   :  { %957 = vmatmul.mubr.msk.f32.vlgmr.msra.gmra.mrb[2].mxu1 %vm34_vm1, %v262_v31 }
 0x24b   :  { %1057 = vmatpush3.bf16.msra.mxu1 %v1165_v5  ;;  %978 = vmatprep.mubr.msk.f32.mxu1 %vm1137_vm0, %v1138_v14 }
 0x24c   :  { %1058 = vmatprep.subr.bf16.mxu1 %v1136_v4 }
 0x24f   :  { %1060 = vmatpush3.bf16.msra.mxu1 %v1187_v13 }
 0x250   :  { %1067 = vmatprep.subr.bf16.mxu1 %v1136_v4 }
 0x31d   :  { %v331_v32 = vpop.f32.mrb[2].mxu1 }
 0x31e   :  { %v336_v33 = vrot.slane %v331_v32, 6  ;;  %v958_v34 = vpop.f32.mrb[3].mxu1 }
 0x320   :  { %v338_v35 = vadd.f32 %v336_v33, %v1213_v22 }
 0x322   :  { %1095 = vtanh.f32 %v338_v35 }
 0x32c   :  { %v1096_v36 = vpop.eup %1095 }
 0x32d   :  { %v341_v38 = vrot.slane %v1096_v36, 2  ;;  %v738_v39 = vsel %vm737_vm4, %v736_v37, %v1096_v36 }
 0x32f   :  { %968 = vmatmul.mubr.msk.f32.vlgmr.msra.gmra.mrb[4].mxu0 %vm34_vm1, %v341_v38 }
 0x330   :  { %1063 = vmatpush3.bf16.msra.mxu0 %v1165_v5  ;;  %989 = vmatprep.mubr.msk.f32.mxu0 %vm1137_vm0, %v1138_v14 }
 0x331   :  { %1064 = vmatprep.subr.bf16.mxu0 %v1136_v4 }
 0x334   :  { %1066 = vmatpush3.bf16.msra.mxu0 %v1187_v13 }
 0x335   :  { %1073 = vmatprep.subr.bf16.mxu0 %v1136_v4 }
 0x402   :  { %v410_v40 = vpop.f32.mrb[4].mxu0 }
 0x403   :  { %v415_v41 = vrot.slane %v410_v40, 5  ;;  %v969_v42 = vpop.f32.mrb[5].mxu0 }
 0x405   :  { %v417_v43 = vadd.f32 %v415_v41, %v1213_v22 }
 0x407   :  { %1097 = vtanh.f32 %v417_v43 }
 0x411   :  { %v1098_v44 = vpop.eup %1097 }
 0x412   :  { %v420_v45 = vrot.slane %v1098_v44, 3  ;;  %v740_v46 = vsel %vm739_vm5, %v738_v39, %v1098_v44 }
 0x414   :  { %979 = vmatmul.mubr.msk.f32.vlgmr.msra.gmra.mrb[4].mxu1 %vm34_vm1, %v420_v45 }
 0x415   :  { %1069 = vmatpush3.bf16.msra.mxu1 %v1165_v5  ;;  %1000 = vmatprep.mubr.msk.f32.mxu1 %vm1137_vm0, %v1138_v14 }
 0x416   :  { %1070 = vmatprep.subr.bf16.mxu1 %v1136_v4 }
 0x419   :  { %1072 = vmatpush3.bf16.msra.mxu1 %v1187_v13 }
 0x41a   :  { %1079 = vmatprep.subr.bf16.mxu1 %v1136_v4 }
 0x4e7   :  { %v489_v47 = vpop.f32.mrb[4].mxu1 }
 0x4e8   :  { %v494_v48 = vrot.slane %v489_v47, 4  ;;  %v980_v49 = vpop.f32.mrb[5].mxu1 }
 0x4ea   :  { %v496_v50 = vadd.f32 %v494_v48, %v1213_v22 }
 0x4ec   :  { %1099 = vtanh.f32 %v496_v50 }
 0x4f6   :  { %v1100_v51 = vpop.eup %1099 }
 0x4f7   :  { %v499_v52 = vrot.slane %v1100_v51, 4  ;;  %v742_v53 = vsel %vm741_vm6, %v740_v46, %v1100_v51 }
 0x4f9   :  { %990 = vmatmul.mubr.msk.f32.vlgmr.msra.gmra.mrb[6].mxu0 %vm34_vm1, %v499_v52 }
 0x4fa   :  { %1075 = vmatpush3.bf16.msra.mxu0 %v1165_v5  ;;  %1011 = vmatprep.mubr.msk.f32.mxu0 %vm1137_vm0, %v1138_v14  ;;  %v20_v5 = vld [vmem:[%s1294_s1 + $0x40] sm:$0xff]  ;;  %s846_s1 = sshll.u32 %s1139_s8, 4  ;;  %s847_s1 = int_to_ptr.vmem [resolvable:$true] %s846_s1 }
 0x4fb   :  { %1076 = vmatprep.subr.bf16.mxu0 %v1136_v4  ;;  %v1080_v8 = vpack.c.bf16 %v21_v6, %v20_v5  ;;  %s1111_s9 = scalar_lea.vmem %s847_s1, 128  ;;  %p1116_p1 = scmp.lt.s32.totalorder %s847_s1, %s847_s1 }
 0x4fc   :  { %p1112_p0 = scmp.ne.s32.totalorder %s847_s1, %s1111_s9  ;;  %p1117_p2 = scmp.lt.s32.totalorder %s1111_s9, %s1111_s9 }
 0x4fe   :  { %1078 = vmatpush3.bf16.msra.mxu0 %v1187_v13  ;;  %p1118_p3 = por %p1117_p2, %p1116_p1 }
 0x500   :  { %p1119_p4 = pnand %p1118_p3, %p1112_p0 }
 0x5cc   :  { %v568_v54 = vpop.f32.mrb[6].mxu0 }
 0x5cd   :  { %v573_v55 = vrot.slane %v568_v54, 3  ;;  %v991_v56 = vpop.f32.mrb[7].mxu0 }
 0x5cf   :  { %v575_v57 = vadd.f32 %v573_v55, %v1213_v22 }
 0x5d1   :  { %1101 = vtanh.f32 %v575_v57 }
 0x5db   :  { %v1102_v58 = vpop.eup %1101 }
 0x5dc   :  { %v578_v59 = vrot.slane %v1102_v58, 5  ;;  %v744_v60 = vsel %vm743_vm7, %v742_v53, %v1102_v58 }
 0x5de   :  { %1001 = vmatmul.mubr.msk.f32.vlgmr.msra.gmra.mrb[6].mxu1 %vm34_vm1, %v578_v59 }
 0x5df   :  { %1022 = vmatprep.mubr.msk.f32.mxu1 %vm1137_vm0, %v1138_v14  ;;  %1081 = vmatpush3.bf16.msra.mxu1 %v1080_v8 }
 0x5e0   :  { %1082 = vmatprep.subr.bf16.mxu1 %v1136_v4 }
 0x5e3   :  { %1084 = vmatpush3.bf16.msra.mxu1 %v1083_v10 }
 0x6b1   :  { %v647_v61 = vpop.f32.mrb[6].mxu1 }
 0x6b2   :  { %v652_v62 = vrot.slane %v647_v61, 2  ;;  %v1002_v63 = vpop.f32.mrb[7].mxu1 }
 0x6b4   :  { %v654_v0 = vadd.f32 %v652_v62, %v1213_v22 }
 0x6b6   :  { %1103 = vtanh.f32 %v654_v0 }
 0x6c0   :  { %v1104_v1 = vpop.eup %1103 }
 0x6c1   :  { %v657_v2 = vrot.slane %v1104_v1, 6  ;;  %v746_v3 = vsel %vm745_vm8, %v744_v60, %v1104_v1 }
 0x6c3   :  { %1012 = vmatmul.mubr.msk.f32.vlgmr.msra.gmra.mrb[8].mxu0 %vm34_vm1, %v657_v2 }
 0x796   :  { %v726_v11 = vpop.f32.mrb[8].mxu0 }
 0x797   :  { %v731_v12 = vrot.slane %v726_v11, 1  ;;  %v1013_v13 = vpop.f32.mrb[9].mxu0 }
 0x799   :  { %v733_v14 = vadd.f32 %v731_v12, %v1213_v22 }
 0x79b   :  { %1105 = vtanh.f32 %v733_v14 }
 0x7a5   :  { %v1106_v15 = vpop.eup %1105 }
 0x7a6   :  { %v748_v16 = vsel %vm747_vm9, %v746_v3, %v1106_v15 }
 0x7a7   :  { %1023 = vmatmul.mubr.msk.f32.vlgmr.msra.gmra.mrb[8].mxu1 %vm34_vm1, %v748_v16 }
 0x87a   :  { %v822_v18 = vpop.f32.mrb[8].mxu1 }
 0x87b   :  { %v823_v19 = vadd.f32 %v863_v17, %v822_v18  ;;  %v1024_v20 = vpop.f32.mrb[9].mxu1 }
 0x87d   :  { %v826_v4 = vsel %vm34_vm1, %v823_v19, -inf }
 0x87e   :  { %827 = vmax.xlane.f32.xlu0 %v826_v4 }
 0x90b   :  { %v828_v21 = vpop.xlane.xlu0 %827 }
 0x90c   :  { %v829_v23 = vsub.f32 %v823_v19, %v828_v21 }
 0x90e   :  { %v830_v24 = vmul.f32 1.442695, %v829_v23 }
 0x910   :  { %1107 = vpow2.f32 %v830_v24 }
 0x91a   :  { %v1108_v22 = vpop.eup %1107 }
 0x91b   :  { %v832_v25 = vsel %vm34_vm1, %v1108_v22, 0.0 }
 0x91c   :  { %833 = vadd.xlane.f32.xlu1 %v832_v25 }
 0x9a9   :  { %v834_v26 = vpop.xlane.xlu1 %833 }
 0x9aa   :  { %1109 = vlog2.f32 %v834_v26 }
 0x9b4   :  { %v1110_v27 = vpop.eup %1109 }
 0x9b5   :  { %v836_v28 = vmul.f32 0.6931472, %v1110_v27 }
 0x9b7   :  { %v837_v29 = vadd.f32 %v836_v28, %v828_v21 }
 0x9b9   :  { %v838_v30 = vsub.f32 %v823_v19, %v837_v29 }
 0x9bb   :  { %839 = vst.msk [vmem:[#allocation2] sm:$0xff] %vm34_vm1, %v838_v30 }
 0x9bc   :  { %1122 = shalt.err (!%p1119_p4)
}
 0x9bd   :  { %s1123_s12 = scalar_lea.hbm %s1295_s2, 128 }
 0x9be   :  { %p1124_p5 = scmp.ne.s32.totalorder %s1295_s2, %s1123_s12  ;;  %p1127_p6 = scmp.lt.u32.totalorder %s1123_s12, %s1295_s2 }
 0x9c0   :  { %p1129_p7 = pnand %p1127_p6, %p1124_p5 }
 0x9c2   :  { %1132 = shalt.err (!%p1129_p7)
}
 0x9c3   :  { %849 = dma.vmem_to_hbm [thread:$0]  %s847_s1, 128, %s1295_s2, [#allocation3]  }
 0x9c4   :  { %1133 = dma.done.wait [#allocation3], 128  }
 0x9c5   :  { %1134 = vsyncadd [#allocation3], 4294967168 }
 0x9c6   :  { %853 = vsyncpa [#allocation3], 1 }

</bundles_post_ra>
